<compile_context>
chip_gen: v7x
topology: tpu7x:2x2x1
jax: 0.10.0
libtpu: 0.0.40
codegen_flags: <defaults>
</compile_context>

<pallas_src>
import functools
import math

import jax
import jax.numpy as jnp
from jax import lax
from jax.experimental import pallas as pl
from jax.experimental.pallas import tpu as pltpu


# ----------------------------------------------------------------------------
# compiler params / tiling helpers
# ----------------------------------------------------------------------------
_VMEM_LIMIT = None
_ROW_TILE_BUDGET = 8 * 1024 * 1024          # double-buffered activation tiles per kernel


def _vmem_limit_bytes():
    # generation-aware scoped-VMEM limit (v5e/v6e: 128 MiB physical, v7x: 64 MiB)
    try:
        cap = pltpu.get_tpu_info().vmem_capacity_bytes
        return int(min(cap * 3 // 4, 96 * 1024 * 1024))
    except Exception:
        return 48 * 1024 * 1024


def _compiler_params(dimension_semantics):
    global _VMEM_LIMIT
    if _VMEM_LIMIT is None:
        _VMEM_LIMIT = _vmem_limit_bytes()
    return pltpu.CompilerParams(dimension_semantics=dimension_semantics,
                                vmem_limit_bytes=_VMEM_LIMIT)


def _row_tile(m, bytes_per_row):
    # largest row tile (multiple of 8, dividing m) whose double-buffered tiles fit budget
    for t in (1024, 512, 256, 128, 64, 32, 16, 8):
        if m % t == 0 and 2 * t * bytes_per_row <= _ROW_TILE_BUDGET:
            return t
    if m % 8 == 0:
        return 8
    if m <= 1024:
        return m                               # tiny ragged shapes: single block
    raise ValueError(f"row count {m} is not a multiple of 8; pad batch*seq")


def _col_tile(n):
    # prefer multiples of 256 (v6e/v7x MXU), 128 (v5e); else full width
    for t in (512, 256, 128):
        if n % t == 0:
            return t
    return n


def _kv_tile(lk):
    for t in (512, 256, 128):
        if lk % t == 0:
            return t
    return lk


# ----------------------------------------------------------------------------
# kernels
# ----------------------------------------------------------------------------
def _linear_kernel(x_ref, w_ref, b_ref, o_ref):
    # o = x @ W + b   (bf16 MXU operands, f32 accumulation, bf16 store)
    x = x_ref[...].astype(jnp.bfloat16)
    y = jnp.dot(x, w_ref[...], preferred_element_type=jnp.float32) + b_ref[...]
    o_ref[...] = y.astype(o_ref.dtype)


def _proj_add_ln_kernel(a_ref, res_ref, w_ref, b_ref, g_ref, beta_ref, o_ref, *, eps):
    # o = LayerNorm(res + a @ W + b) * g + beta   (fused out-proj + residual + LN)
    y = jnp.dot(a_ref[...], w_ref[...], preferred_element_type=jnp.float32) + b_ref[...]
    z = res_ref[...] + y
    mean = jnp.mean(z, axis=-1, keepdims=True)
    var = jnp.mean((z - mean) ** 2, axis=-1, keepdims=True)
    o_ref[...] = ((z - mean) * lax.rsqrt(var + eps) * g_ref[...] + beta_ref[...]
                  ).astype(o_ref.dtype)


def _ffn_add_ln_kernel(x_ref, w1_ref, b1_ref, w2_ref, b2_ref, g_ref, beta_ref,
                       o_ref, acc_ref, *, eps):
    # dim_feedforward is the inner reduction grid axis: accumulate
    #   relu(x @ W1_chunk + b1_chunk) @ W2_chunk   into a (tm, d) f32 scratch,
    # then residual + LayerNorm at finalize.
    f = pl.program_id(1)

    @pl.when(f == 0)
    def _():
        acc_ref[...] = jnp.zeros(acc_ref.shape, acc_ref.dtype)

    xb = x_ref[...].astype(jnp.bfloat16)
    h = jnp.dot(xb, w1_ref[...], preferred_element_type=jnp.float32) + b1_ref[...]
    h = jnp.maximum(h, 0.0)
    acc_ref[...] += jnp.dot(h.astype(jnp.bfloat16), w2_ref[...],
                            preferred_element_type=jnp.float32)

    @pl.when(f == pl.num_programs(1) - 1)
    def _():
        z = x_ref[...] + acc_ref[...] + b2_ref[...]
        mean = jnp.mean(z, axis=-1, keepdims=True)
        var = jnp.mean((z - mean) ** 2, axis=-1, keepdims=True)
        o_ref[...] = ((z - mean) * lax.rsqrt(var + eps) * g_ref[...] + beta_ref[...]
                      ).astype(o_ref.dtype)


def _flash_attn_kernel(q_ref, k_ref, v_ref, o_ref, m_sc, l_sc, acc_sc, *, scale):
    # one (batch, head) pair per parallel outer step; KV chunks on the inner "arbitrary"
    # axis; online softmax with f32 m/l/acc scratch; per-(n,h) output block at finalize.
    kv = pl.program_id(2)

    @pl.when(kv == 0)
    def _():
        m_sc[...] = jnp.full(m_sc.shape, -jnp.inf, m_sc.dtype)
        l_sc[...] = jnp.zeros(l_sc.shape, l_sc.dtype)
        acc_sc[...] = jnp.zeros(acc_sc.shape, acc_sc.dtype)

    q = q_ref[0, 0]                     # (Lq, Dh) bf16
    k = k_ref[0, 0]                     # (Tk, Dh) bf16
    v = v_ref[0, 0]                     # (Tk, Dh) bf16
    # contract Dh directly (no explicit k.T / XLU transpose)
    s = lax.dot_general(q, k, (((1,), (1,)), ((), ())),
                        preferred_element_type=jnp.float32) * scale
    m_new = jnp.maximum(m_sc[...], jnp.max(s, axis=-1, keepdims=True))
    alpha = jnp.exp(m_sc[...] - m_new)
    p = jnp.exp(s - m_new)
    l_sc[...] = alpha * l_sc[...] + jnp.sum(p, axis=-1, keepdims=True)
    acc_sc[...] = alpha * acc_sc[...] + jnp.dot(p.astype(jnp.bfloat16), v,
                                                preferred_element_type=jnp.float32)
    m_sc[...] = m_new

    @pl.when(kv == pl.num_programs(2) - 1)
    def _():
        inv = pl.reciprocal(l_sc[...], approx=True)    # EUP slot, VALU-free
        o_ref[0, 0] = (acc_sc[...] * inv).astype(o_ref.dtype)


# ----------------------------------------------------------------------------
# wrappers (grids + BlockSpecs)
# ----------------------------------------------------------------------------
def linear(x2d, w, b):
    m, din = x2d.shape
    dout = w.shape[1]
    tn = _col_tile(dout)
    tm = _row_tile(m, 4 * din + 2 * tn)
    return pl.pallas_call(
        _linear_kernel,
        out_shape=jax.ShapeDtypeStruct((m, dout), jnp.bfloat16),
        grid=(m // tm, dout // tn),
        in_specs=[
            pl.BlockSpec((tm, din), lambda i, j: (i, 0)),
            pl.BlockSpec((din, tn), lambda i, j: (0, j)),   # weight column chunks stream
            pl.BlockSpec((1, tn), lambda i, j: (0, j)),
        ],
        out_specs=pl.BlockSpec((tm, tn), lambda i, j: (i, j)),
        compiler_params=_compiler_params(("parallel", "parallel")),
    )(x2d, w, b)


def proj_add_layernorm(a2d, res2d, w, b, g, beta, eps=1e-5):
    m, din = a2d.shape
    d = w.shape[1]
    tm = _row_tile(m, 2 * din + 8 * d)
    return pl.pallas_call(
        functools.partial(_proj_add_ln_kernel, eps=eps),
        out_shape=jax.ShapeDtypeStruct((m, d), jnp.float32),
        grid=(m // tm,),
        in_specs=[
            pl.BlockSpec((tm, din), lambda i: (i, 0)),      # attention output (bf16)
            pl.BlockSpec((tm, d), lambda i: (i, 0)),        # residual (f32)
            pl.BlockSpec((din, d), lambda i: (0, 0)),       # bf16 weight, grid-constant
            pl.BlockSpec((1, d), lambda i: (0, 0)),
            pl.BlockSpec((1, d), lambda i: (0, 0)),
            pl.BlockSpec((1, d), lambda i: (0, 0)),
        ],
        out_specs=pl.BlockSpec((tm, d), lambda i: (i, 0)),
        compiler_params=_compiler_params(("parallel",)),
    )(a2d, res2d, w, b, g, beta)


def ffn_add_layernorm(x2d, w1, b1, w2, b2, g, beta, eps=1e-5):
    m, d = x2d.shape
    dff = w1.shape[1]
    tf = _col_tile(dff)
    tm = _row_tile(m, 8 * d + 6 * tf)
    return pl.pallas_call(
        functools.partial(_ffn_add_ln_kernel, eps=eps),
        out_shape=jax.ShapeDtypeStruct((m, d), jnp.float32),
        grid=(m // tm, dff // tf),
        in_specs=[
            pl.BlockSpec((tm, d), lambda i, f: (i, 0)),     # x: FFN input AND residual
            pl.BlockSpec((d, tf), lambda i, f: (0, f)),     # W1 chunk streams over f
            pl.BlockSpec((1, tf), lambda i, f: (0, f)),
            pl.BlockSpec((tf, d), lambda i, f: (f, 0)),     # W2 chunk streams over f
            pl.BlockSpec((1, d), lambda i, f: (0, 0)),
            pl.BlockSpec((1, d), lambda i, f: (0, 0)),
            pl.BlockSpec((1, d), lambda i, f: (0, 0)),
        ],
        out_specs=pl.BlockSpec((tm, d), lambda i, f: (i, 0)),
        scratch_shapes=[pltpu.VMEM((tm, d), jnp.float32)],
        compiler_params=_compiler_params(("parallel", "arbitrary")),
    )(x2d, w1, b1, w2, b2, g, beta)


def sdpa_heads(q, k, v):
    # q: (N, H, Lq, Dh), k/v: (N, H, Lk, Dh), all bf16; BlockSpec does the head split.
    # TODO(synk): attn_mask / is_causal masking not implemented.
    # TODO(synk): also chunk Lq for very long query sequences.
    n, h, lq, dh = q.shape
    lk = k.shape[2]
    tk = _kv_tile(lk)
    scale = 1.0 / math.sqrt(dh)
    return pl.pallas_call(
        functools.partial(_flash_attn_kernel, scale=scale),
        out_shape=jax.ShapeDtypeStruct((n, h, lq, dh), jnp.bfloat16),
        grid=(n, h, lk // tk),
        in_specs=[
            pl.BlockSpec((1, 1, lq, dh), lambda b, hh, kv: (b, hh, 0, 0)),
            pl.BlockSpec((1, 1, tk, dh), lambda b, hh, kv: (b, hh, kv, 0)),
            pl.BlockSpec((1, 1, tk, dh), lambda b, hh, kv: (b, hh, kv, 0)),
        ],
        out_specs=pl.BlockSpec((1, 1, lq, dh), lambda b, hh, kv: (b, hh, 0, 0)),
        scratch_shapes=[
            pltpu.VMEM((lq, 1), jnp.float32),    # m
            pltpu.VMEM((lq, 1), jnp.float32),    # l
            pltpu.VMEM((lq, dh), jnp.float32),   # acc
        ],
        compiler_params=_compiler_params(("parallel", "parallel", "arbitrary")),
    )(q, k, v)


# ----------------------------------------------------------------------------
# attention blocks (out-projection fused into the residual+LN kernel)
# ----------------------------------------------------------------------------
def _split_heads(x2d, n, l, nheads, dh):
    # (n*l, nheads*dh) -> (n, nheads, l, dh)   (head-major for per-head grid/BlockSpec)
    return x2d.reshape(n, l, nheads, dh).transpose(0, 2, 1, 3)


def _merge_heads(x):
    # (n, nheads, l, dh) -> (n*l, nheads*dh)
    n, h, l, dh = x.shape
    return x.transpose(0, 2, 1, 3).reshape(n * l, h * dh)


def self_attention(x, p, nheads):
    # packed QKV projection in ONE column-tiled matmul; head-major q/k/v slices
    n, l, e = x.shape
    dh = e // nheads
    qkv = linear(x.reshape(-1, e), p["w_packed"], p["b_packed"])          # (n*l, 3e) bf16
    q = _split_heads(qkv[:, :e], n, l, nheads, dh)
    k = _split_heads(qkv[:, e:2 * e], n, l, nheads, dh)
    v = _split_heads(qkv[:, 2 * e:], n, l, nheads, dh)
    return _merge_heads(sdpa_heads(q, k, v))                              # (n*l, e) bf16


def cross_attention(x, mem, p, nheads):
    n, lq, e = x.shape
    lk = mem.shape[1]
    dh = e // nheads
    q2d = linear(x.reshape(-1, e), p["w_packed"][:, :e], p["b_packed"][:, :e])
    kv2d = linear(mem.reshape(-1, e), p["w_packed"][:, e:], p["b_packed"][:, e:])
    q = _split_heads(q2d, n, lq, nheads, dh)
    k = _split_heads(kv2d[:, :e], n, lk, nheads, dh)
    v = _split_heads(kv2d[:, e:], n, lk, nheads, dh)
    return _merge_heads(sdpa_heads(q, k, v))


# ----------------------------------------------------------------------------
# decoder layer (norm_first=False; dropout = identity / inference)
# ----------------------------------------------------------------------------
def transformer_decoder_layer(tgt, memory, params, nheads, eps=1e-5):
    # x = norm1(x + SA(x)); x = norm2(x + CA(x, mem)); x = norm3(x + FF(x))
    # TODO(synk): tgt_mask / memory_mask / is_causal and training-mode dropout not implemented.
    n, l, d = tgt.shape
    x2d = tgt.reshape(-1, d)

    sa = self_attention(tgt, params["self_attn"], nheads)
    x2d = proj_add_layernorm(sa, x2d,
                             params["self_attn"]["w_out"], params["self_attn"]["b_out"],
                             params["ln1_g"], params["ln1_b"], eps)

    ca = cross_attention(x2d.reshape(n, l, d), memory, params["cross_attn"], nheads)
    x2d = proj_add_layernorm(ca, x2d,
                             params["cross_attn"]["w_out"], params["cross_attn"]["b_out"],
                             params["ln2_g"], params["ln2_b"], eps)

    x2d = ffn_add_layernorm(x2d, params["w1"], params["b1"], params["w2"], params["b2"],
                            params["ln3_g"], params["ln3_b"], eps)
    return x2d.reshape(n, l, d)


# ----------------------------------------------------------------------------
# deterministic parameter init (weights stored bf16; biases / LN params f32)
# ----------------------------------------------------------------------------
def init_params(key, d_model, nheads, dim_ff):
    ks = jax.random.split(key, 12)
    s = 0.05

    def wgt(k, shape):
        return (s * jax.random.normal(k, shape, jnp.float32)).astype(jnp.bfloat16)

    def bias(k, shape):
        return s * jax.random.normal(k, shape, jnp.float32)

    def mha_params(k1, k2, k3, k4):
        return {
            "w_packed": wgt(k1, (d_model, 3 * d_model)),
            "b_packed": bias(k2, (1, 3 * d_model)),
            "w_out": wgt(k3, (d_model, d_model)),
            "b_out": bias(k4, (1, d_model)),
        }

    return {
        "self_attn": mha_params(ks[0], ks[1], ks[2], ks[3]),
        "cross_attn": mha_params(ks[4], ks[5], ks[6], ks[7]),
        "w1": wgt(ks[8], (d_model, dim_ff)),
        "b1": bias(ks[9], (1, dim_ff)),
        "w2": wgt(ks[10], (dim_ff, d_model)),
        "b2": bias(ks[11], (1, d_model)),
        "ln1_g": jnp.ones((1, d_model), jnp.float32),
        "ln1_b": jnp.zeros((1, d_model), jnp.float32),
        "ln2_g": jnp.ones((1, d_model), jnp.float32),
        "ln2_b": jnp.zeros((1, d_model), jnp.float32),
        "ln3_g": jnp.ones((1, d_model), jnp.float32),
        "ln3_b": jnp.zeros((1, d_model), jnp.float32),
    }


if __name__ == "__main__":
    d_model, nhead, dim_ff = 32, 4, 64
    N, L_tgt, L_mem = 2, 8, 8

    root = jax.random.PRNGKey(0)
    k_p, k_t, k_m = jax.random.split(root, 3)
    params = init_params(k_p, d_model, nhead, dim_ff)
    tgt = jax.random.normal(k_t, (N, L_tgt, d_model), jnp.float32)
    memory = jax.random.normal(k_m, (N, L_mem, d_model), jnp.float32)

    out = transformer_decoder_layer(tgt, memory, params, nhead)
    out = jax.block_until_ready(out)
    assert out.shape == (N, L_tgt, d_model)
    assert bool(jnp.all(jnp.isfinite(out)))
    print("KERNEL_OK")
</pallas_src>

<mosaic_0001>
module attributes {stable_mosaic.version = 11 : i64} {
  func.func @_linear_kernel(%arg0: i32, %arg1: i32, %arg2: memref<16x32xf32, #tpu.memory_space<vmem>>, %arg3: memref<32x96xbf16, #tpu.memory_space<vmem>>, %arg4: memref<1x96xf32, #tpu.memory_space<vmem>>, %arg5: memref<16x96xbf16, #tpu.memory_space<vmem>>) attributes {dimension_semantics = [#tpu.dimension_semantics<parallel>, #tpu.dimension_semantics<parallel>], iteration_bounds = array<i64: 1, 1>, scalar_prefetch = 0 : i64, scratch_operands = 0 : i64, tpu.core_type = #tpu.core_type<tc>, window_params = [{transform_indices = @transform_0, window_bounds = array<i64: 16, 32>}, {transform_indices = @transform_1, window_bounds = array<i64: 32, 96>}, {transform_indices = @transform_2, window_bounds = array<i64: 1, 96>}, {transform_indices = @transform_3, window_bounds = array<i64: 16, 96>}]} {
    %c0 = arith.constant 0 : index
    %c0_0 = arith.constant 0 : index
    %0 = vector.load %arg2[%c0, %c0_0] : memref<16x32xf32, #tpu.memory_space<vmem>>, vector<16x32xf32>
    %1 = arith.truncf %0 : vector<16x32xf32> to vector<16x32xbf16>
    %c0_1 = arith.constant 0 : index
    %c0_2 = arith.constant 0 : index
    %2 = vector.load %arg3[%c0_1, %c0_2] : memref<32x96xbf16, #tpu.memory_space<vmem>>, vector<32x96xbf16>
    %cst = arith.constant dense<0.000000e+00> : vector<16x96xf32>
    %3 = tpu.matmul %1, %2, %cst {dimension_numbers = #tpu.dot_dimension_numbers<[1], [0], [0], [1], [0, 0, 1, 1], [], []>} : vector<16x32xbf16>, vector<32x96xbf16>, vector<16x96xf32> -> vector<16x96xf32>
    %c0_3 = arith.constant 0 : index
    %c0_4 = arith.constant 0 : index
    %4 = vector.load %arg4[%c0_3, %c0_4] : memref<1x96xf32, #tpu.memory_space<vmem>>, vector<1x96xf32>
    %5 = vector.broadcast %4 : vector<1x96xf32> to vector<16x96xf32>
    %6 = arith.addf %3, %5 : vector<16x96xf32>
    %7 = arith.truncf %6 : vector<16x96xf32> to vector<16x96xbf16>
    %c0_5 = arith.constant 0 : index
    %c0_6 = arith.constant 0 : index
    %8 = vector.load %arg5[%c0_5, %c0_6] : memref<16x96xbf16, #tpu.memory_space<vmem>>, vector<16x96xbf16>
    tpu.vector_store %arg5[%c0_5, %c0_6], %7 {strides = array<i32>} : memref<16x96xbf16, #tpu.memory_space<vmem>>, vector<16x96xbf16>,
    return
  }
  func.func @transform_0(%arg0: i32, %arg1: i32) -> (i32, i32) {
    %c0_i32 = arith.constant 0 : i32
    %c0_i32_0 = arith.constant 0 : i32
    return %arg0, %c0_i32 : i32, i32
  }
  func.func @transform_1(%arg0: i32, %arg1: i32) -> (i32, i32) {
    %c0_i32 = arith.constant 0 : i32
    %c0_i32_0 = arith.constant 0 : i32
    return %c0_i32, %arg1 : i32, i32
  }
  func.func @transform_2(%arg0: i32, %arg1: i32) -> (i32, i32) {
    %c0_i32 = arith.constant 0 : i32
    %c0_i32_0 = arith.constant 0 : i32
    return %c0_i32, %arg1 : i32, i32
  }
  func.func @transform_3(%arg0: i32, %arg1: i32) -> (i32, i32) {
    %c0_i32 = arith.constant 0 : i32
    return %arg0, %arg1 : i32, i32
  }
}

</mosaic_0001>

<bundles_post_ra>
// kernel: tpu_custom_call.1
= control target key start
LH: loop header
LB: loop body
LE: loop exit
PB: predicated region body
PF: predicated region fallthrough
CT: control target
= control target key end

     0   :  { %8 = vsyncpa [#allocation3], 0  ;;  %s320_s0 = inlined_call_operand.hbm [shape: f32[16,32], index: 0, kind: input, shape index: {}]   ;;  %s321_s1 = inlined_call_operand.hbm [shape: bf16[32,96], index: 1, kind: input, shape index: {}]   ;;  %s322_s2 = inlined_call_operand.vmem [shape: f32[1,96], index: 2, kind: input, shape index: {}]   ;;  %s323_s3 = inlined_call_operand.hbm [shape: bf16[16,96], index: 3, kind: output, shape index: {}]  }
   0x1   :  { %9 = vsyncpa [#allocation6], 0 }
   0x2   :  { %10 = vsyncpa [#allocation4], 0  ;;  %s246_s12 = smov [#allocation2]   ;;  %s174_s16 = scalar_lea.hbm %s320_s0, 256 }
   0x3   :  { %s16_s13 = sshll.u32 %s246_s12, 4  ;;  %p175_p0 = scmp.ne.s32.totalorder %s320_s0, %s174_s16  ;;  %s17_s13 = int_to_ptr.vmem [resolvable:$true] %s16_s13 }
   0x4   :  { %p178_p1 = scmp.lt.u32.totalorder %s174_s16, %s320_s0 }
   0x6   :  { %p180_p2 = pnand %p178_p1, %p175_p0 }
   0x8   :  { %183 = shalt.err (!%p180_p2)
}
   0x9   :  { %s184_s21 = scalar_lea.vmem %s17_s13, 256  ;;  %p189_p4 = scmp.lt.s32.totalorder %s17_s13, %s17_s13 }
   0xa   :  { %p185_p3 = scmp.ne.s32.totalorder %s17_s13, %s184_s21  ;;  %p190_p5 = scmp.lt.s32.totalorder %s184_s21, %s184_s21 }
   0xc   :  { %p191_p6 = por %p190_p5, %p189_p4 }
   0xe   :  { %p192_p7 = pnand %p191_p6, %p185_p3 }
  0x10   :  { %195 = shalt.err (!%p192_p7)
}
  0x11   :  { %s247_s22 = smov 128   ;;  %s248_s23 = smov 8  }
  0x12   :  { %22 = dma.hbm_to_vmem [thread:$0]  %s320_s0, 256, %s17_s13, [#allocation3], %s247_s22, %s247_s22, %s248_s23  }
  0x13   :  { %s249_s26 = smov [#allocation5]   ;;  %s196_s30 = scalar_lea.hbm %s321_s1, 256 }
  0x14   :  { %s28_s27 = sshll.u32 %s249_s26, 4  ;;  %p197_p8 = scmp.ne.s32.totalorder %s321_s1, %s196_s30  ;;  %s29_s27 = int_to_ptr.vmem [resolvable:$true] %s28_s27 }
  0x15   :  { %p200_p9 = scmp.lt.u32.totalorder %s196_s30, %s321_s1 }
  0x17   :  { %p202_p10 = pnand %p200_p9, %p197_p8 }
  0x19   :  { %205 = shalt.err (!%p202_p10)
}
  0x1a   :  { %s206_s8 = scalar_lea.vmem %s29_s27, 256  ;;  %p211_p12 = scmp.lt.s32.totalorder %s29_s27, %s29_s27 }
  0x1b   :  { %p207_p11 = scmp.ne.s32.totalorder %s29_s27, %s206_s8  ;;  %p212_p13 = scmp.lt.s32.totalorder %s206_s8, %s206_s8 }
  0x1d   :  { %p213_p0 = por %p212_p13, %p211_p12 }
  0x1f   :  { %p214_p1 = pnand %p213_p0, %p207_p11 }
  0x21   :  { %217 = shalt.err (!%p214_p1)
}
  0x22   :  { %s250_s0 = smov 64   ;;  %s251_s9 = smov 4  }
  0x23   :  { %34 = dma.hbm_to_vmem [thread:$0]  %s321_s1, 256, %s29_s27, [#allocation6], %s250_s0, %s250_s0, %s251_s9  }
  0x24   :  { %240 = dma.done.wait [#allocation3], 256  }
  0x25   :  { %241 = vsyncadd [#allocation3], 4294967040 }
  0x26   :  { %242 = dma.done.wait [#allocation6], 256  }
  0x27   :  { %243 = vsyncadd [#allocation6], 4294967040  ;;  %v252_v0 = vmov 0.0   ;;  %vm253_vm0 = vmmov 0   ;;  %v172_v1 = vld [vmem:[#allocation5] sm:$0xff]   ;;  %v173_v2 = vld [vmem:[#allocation5 + $0x8] sm:$0xff]  }
  0x28   :  { %155 = vmatprep.subr.bf16.mxu0 %v252_v0  ;;  %159 = vmatprep.mubr.msk.bf16.mxu0 %vm253_vm0, %v252_v0  ;;  %v44_v3 = vld [vmem:[#allocation2] sm:$0xff]  ;;  %v45_v4 = vld [vmem:[#allocation2 + $0x8] sm:$0xff]  ;;  %vm70_vm1 = vcmask 261120   ;;  %vm123_vm2 = vcmask 781312   ;;  %s254_s13 = smov [#allocation7]  }
  0x29   :  { %156 = vmatpush3.bf16.msra.mxu0 %v172_v1  ;;  %v46_v5 = vpack.c.bf16 %v45_v4, %v44_v3  ;;  %v144_v6 = vld [vmem:[%s322_s2] ss:$0 sm:$0xff]  ;;  %s131_s14 = sshll.u32 %s254_s13, 4  ;;  %s132_s14 = int_to_ptr.vmem [resolvable:$true] %s131_s14 }
  0x2a   :  { %157 = vmatprep.subr.bf16.mxu0 %v252_v0  ;;  %s218_s15 = scalar_lea.vmem %s132_s14, 128  ;;  %p223_p3 = scmp.lt.s32.totalorder %s132_s14, %s132_s14 }
  0x2b   :  { %p219_p2 = scmp.ne.s32.totalorder %s132_s14, %s218_s15  ;;  %p224_p4 = scmp.lt.s32.totalorder %s218_s15, %s218_s15 }
  0x2d   :  { %158 = vmatpush3.bf16.msra.mxu0 %v173_v2  ;;  %p225_p5 = por %p224_p4, %p223_p3 }
  0x2f   :  { %p226_p6 = pnand %p225_p5, %p219_p2 }
  0x30   :  { %160 = vmatmul.mubr.msk.bf16.vlgmr.msra.gmra.mrb[0].mxu0 %vm70_vm1, %v46_v5 }
 0x103   :  { %v108_v7 = vpop.f32.mrb[0].mxu0 }
 0x104   :  { %v109_v8 = vadd.f32 %v144_v6, %v108_v7  ;;  %v161_v9 = vpop.f32.mrb[1].mxu0 }
 0x105   :  { %v111_v10 = vpop.f32.mrb[2].mxu0 }
 0x106   :  { %v150_v11 = vpack.c.bf16 %v109_v8, %v109_v8  ;;  %v112_v12 = vadd.f32 %v144_v6, %v111_v10  ;;  %v162_v13 = vpop.f32.mrb[3].mxu0 }
 0x108   :  { %v151_v14 = vpack.c.bf16 %v112_v12, %v112_v12  ;;  %124 = vst.msk [vmem:[#allocation7] sm:$0xf] %vm123_vm2, %v150_v11 }
 0x10a   :  { %125 = vst.msk [vmem:[#allocation7 + $0x4] sm:$0xf] %vm123_vm2, %v151_v14 }
 0x10b   :  { %229 = shalt.err (!%p226_p6)
}
 0x10c   :  { %s230_s17 = scalar_lea.hbm %s323_s3, 128 }
 0x10d   :  { %p231_p7 = scmp.ne.s32.totalorder %s323_s3, %s230_s17  ;;  %p234_p8 = scmp.lt.u32.totalorder %s230_s17, %s323_s3 }
 0x10f   :  { %p236_p9 = pnand %p234_p8, %p231_p7 }
 0x111   :  { %239 = shalt.err (!%p236_p9)
}
 0x112   :  { %137 = dma.vmem_to_hbm [thread:$0]  %s132_s14, 128, %s323_s3, [#allocation4], %s250_s0, %s250_s0, %s251_s9  }
 0x113   :  { %244 = dma.done.wait [#allocation4], 128  }
 0x114   :  { %245 = vsyncadd [#allocation4], 4294967168 }
 0x115   :  { %141 = vsyncpa [#allocation3], 1 }
 0x116   :  { %142 = vsyncpa [#allocation6], 1 }
 0x117   :  { %143 = vsyncpa [#allocation4], 1 }

</bundles_post_ra>
